<compile_context>
chip_gen: v6e
topology: v6e:2x2x1
jax: 0.10.0
libtpu: 0.0.40
codegen_flags: <defaults>
</compile_context>

<pallas_src>
import functools

import jax
import jax.numpy as jnp
from jax.experimental import pallas as pl
from jax.experimental.pallas import tpu as pltpu


def _round_up(a, b):
    return (a + b - 1) // b * b


def _gating_kernel(x_ref, y_ref, wy_ref, ux_ref, ug_ref, b_ref, out_ref, *, dp):
    # Native-dtype activations feed the MXU; accumulation is f32.
    x = x_ref[...]
    y = y_ref[...]

    # Fused y path: y @ [Wr | Wz | Wg]  -> (tm, 3*dp), pre-summed bias added once.
    yw = jnp.dot(y, wy_ref[...], preferred_element_type=jnp.float32) + b_ref[...]
    # Fused x path: x @ [Ur | Uz]       -> (tm, 2*dp).
    xu = jnp.dot(x, ux_ref[...], preferred_element_type=jnp.float32)

    xf = x.astype(jnp.float32)
    r = jax.nn.sigmoid(yw[:, 0:dp] + xu[:, 0:dp])
    z = jax.nn.sigmoid(yw[:, dp:2 * dp] + xu[:, dp:2 * dp])

    rx = (r * xf).astype(x_ref.dtype)
    h = jnp.tanh(yw[:, 2 * dp:3 * dp]
                 + jnp.dot(rx, ug_ref[...], preferred_element_type=jnp.float32))

    g = (1.0 - z) * xf + z * h
    out_ref[...] = g.astype(out_ref.dtype)


def prepare_gating_params(params, bg=0.1, dtype=jnp.float32):
    """One-time parameter prep (do NOT redo per forward call):
    transpose PyTorch (out,in) Linears to (in,out), zero-pad the feature dim to
    a multiple of 128, fuse [Wr|Wz|Wg] and [Ur|Uz], pre-sum the bias pairs and
    fold -bg into the z bias. Optionally cast weights to bf16 for 2x MXU rate."""
    d = params["Wr_w"].shape[0]
    dp = _round_up(d, 128)

    def wt(name):  # (out, in) torch layout -> (in, out), padded to (dp, dp)
        return jnp.pad(params[f"{name}_w"].T, ((0, dp - d), (0, dp - d)))

    def pb(vec):
        return jnp.pad(vec, (0, dp - d))

    wy = jnp.concatenate([wt("Wr"), wt("Wz"), wt("Wg")], axis=1).astype(dtype)  # (dp, 3dp)
    ux = jnp.concatenate([wt("Ur"), wt("Uz")], axis=1).astype(dtype)            # (dp, 2dp)
    ug = wt("Ug").astype(dtype)                                                 # (dp, dp)
    b = jnp.concatenate([
        pb(params["Wr_b"] + params["Ur_b"]),
        pb(params["Wz_b"] + params["Uz_b"] - bg),
        pb(params["Wg_b"] + params["Ug_b"]),
    ]).astype(jnp.float32).reshape(1, 3 * dp)                                   # (1, 3dp)
    return {"wy": wy, "ux": ux, "ug": ug, "b": b}


def gating_mechanism(x, y, prep, tm=256):
    """x, y: (..., D). prep: output of prepare_gating_params."""
    d = x.shape[-1]
    dp = prep["ug"].shape[0]
    orig_shape = x.shape

    x2 = x.reshape(-1, d)
    y2 = y.reshape(-1, d)
    m = x2.shape[0]

    # Large row tile for MXU fill, but never bigger than (rounded-up) row count.
    tm = max(8, min(_round_up(tm, 8), _round_up(m, 8)))
    mp = _round_up(m, tm)

    # Zero-padded tail rows + zero-padded feature lanes (sliced off afterwards).
    x2 = jnp.pad(x2, ((0, mp - m), (0, dp - d)))
    y2 = jnp.pad(y2, ((0, mp - m), (0, dp - d)))

    act_bytes = jnp.dtype(x.dtype).itemsize
    w_bytes = jnp.dtype(prep["wy"].dtype).itemsize

    # VMEM footprint estimate: x/y/out row blocks (double-buffered), fused
    # weights (2 buffers, constant index_map so fetched once), bias, f32 temps.
    vmem_est = (3 * 2 * tm * dp * act_bytes
                + 2 * 6 * dp * dp * w_bytes
                + 2 * 3 * dp * 4
                + 8 * tm * dp * 4)
    vmem_limit = int(min(max(2 * vmem_est, 32 * 1024 * 1024), 96 * 1024 * 1024))
    # TODO(synk): for very large D (>= 2048 on v7x) add a K/N grid axis over the
    # fused weight slabs instead of loading full (Dp, 3Dp) blocks.

    cost = pl.CostEstimate(
        flops=2 * mp * dp * (3 * dp + 2 * dp + dp),
        transcendentals=3 * mp * dp,
        bytes_accessed=3 * mp * dp * act_bytes + 6 * dp * dp * w_bytes + 3 * dp * 4,
    )

    row_spec = pl.BlockSpec((tm, dp), lambda i: (i, 0))

    out = pl.pallas_call(
        functools.partial(_gating_kernel, dp=dp),
        out_shape=jax.ShapeDtypeStruct((mp, dp), x.dtype),
        grid_spec=pltpu.PrefetchScalarGridSpec(
            num_scalar_prefetch=0,
            grid=(mp // tm,),
            in_specs=[row_spec, row_spec,
                      pl.BlockSpec((dp, 3 * dp), lambda i: (0, 0)),
                      pl.BlockSpec((dp, 2 * dp), lambda i: (0, 0)),
                      pl.BlockSpec((dp, dp), lambda i: (0, 0)),
                      pl.BlockSpec((1, 3 * dp), lambda i: (0, 0))],
            out_specs=row_spec,
        ),
        compiler_params=pltpu.CompilerParams(
            dimension_semantics=("parallel",),
            vmem_limit_bytes=vmem_limit),
        cost_estimate=cost,
    )(x2, y2, prep["wy"], prep["ux"], prep["ug"], prep["b"])

    return out[:m, :d].reshape(orig_shape)


def _init_params(key, d):
    """Deterministic init mimicking torch.nn.Linear default (U[-1/sqrt(d), 1/sqrt(d)])."""
    names = ["Wr", "Ur", "Wz", "Uz", "Wg", "Ug"]
    bound = 1.0 / jnp.sqrt(d)
    params = {}
    keys = jax.random.split(key, 2 * len(names))
    for i, n in enumerate(names):
        params[f"{n}_w"] = jax.random.uniform(
            keys[2 * i], (d, d), jnp.float32, -bound, bound)   # (out, in), PyTorch layout
        params[f"{n}_b"] = jax.random.uniform(
            keys[2 * i + 1], (d,), jnp.float32, -bound, bound)
    return params


def _ref(x, y, params, bg=0.1):
    def lin(n, v):
        return jnp.dot(v, params[f"{n}_w"].T,
                       precision=jax.lax.Precision.HIGHEST) + params[f"{n}_b"]
    r = jax.nn.sigmoid(lin("Wr", y) + lin("Ur", x))
    z = jax.nn.sigmoid(lin("Wz", y) + lin("Uz", x) - bg)
    h = jnp.tanh(lin("Wg", y) + lin("Ug", r * x))
    return (1.0 - z) * x + z * h


if __name__ == "__main__":
    # Test 1: small shapes matching the module spec (batch=2, seq=8, d_input=32).
    batch, seq, d_input = 2, 8, 32
    key = jax.random.PRNGKey(0)
    kx, ky, kp = jax.random.split(key, 3)

    x = jax.random.normal(kx, (batch, seq, d_input), jnp.float32)
    y = jax.random.normal(ky, (batch, seq, d_input), jnp.float32)
    params = _init_params(kp, d_input)

    prep = prepare_gating_params(params, bg=0.1, dtype=jnp.float32)  # one-time prep
    fn = jax.jit(functools.partial(gating_mechanism, tm=256))
    out = fn(x, y, prep)
    jax.block_until_ready(out)

    ref = _ref(x, y, params, bg=0.1)
    assert out.shape == (batch, seq, d_input)
    assert jnp.allclose(out, ref, atol=1e-5, rtol=1e-5), float(jnp.max(jnp.abs(out - ref)))

    # Test 2: row count not a multiple of 8 and feature dim padded 96 -> 128
    # (exercises the cdiv / zero-padded tail path).
    b2, s2, d2 = 3, 50, 96
    kx2, ky2, kp2 = jax.random.split(jax.random.PRNGKey(1), 3)
    x2 = jax.random.normal(kx2, (b2, s2, d2), jnp.float32)
    y2 = jax.random.normal(ky2, (b2, s2, d2), jnp.float32)
    params2 = _init_params(kp2, d2)
    prep2 = prepare_gating_params(params2, bg=0.1, dtype=jnp.float32)
    out2 = jax.jit(functools.partial(gating_mechanism, tm=256))(x2, y2, prep2)
    jax.block_until_ready(out2)
    ref2 = _ref(x2, y2, params2, bg=0.1)
    assert jnp.allclose(out2, ref2, atol=1e-4, rtol=1e-4), float(jnp.max(jnp.abs(out2 - ref2)))

    # Test 3: bf16 activations + bf16 fused weights (production fast path:
    # 2x MXU rate, half the weight VMEM), f32 accumulation inside the kernel.
    prep_bf16 = prepare_gating_params(params2, bg=0.1, dtype=jnp.bfloat16)
    out_bf16 = jax.jit(functools.partial(gating_mechanism, tm=256))(
        x2.astype(jnp.bfloat16), y2.astype(jnp.bfloat16), prep_bf16)
    jax.block_until_ready(out_bf16)
    assert jnp.allclose(out_bf16.astype(jnp.float32), ref2, atol=0.1, rtol=0.1)

    print("KERNEL_OK")
</pallas_src>

<mosaic_0001>
module attributes {stable_mosaic.version = 11 : i64} {
  func.func @_gating_kernel(%arg0: i32, %arg1: memref<16x128xf32, #tpu.memory_space<vmem>>, %arg2: memref<16x128xf32, #tpu.memory_space<vmem>>, %arg3: memref<128x384xf32, #tpu.memory_space<vmem>>, %arg4: memref<128x256xf32, #tpu.memory_space<vmem>>, %arg5: memref<128x128xf32, #tpu.memory_space<vmem>>, %arg6: memref<1x384xf32, #tpu.memory_space<vmem>>, %arg7: memref<16x128xf32, #tpu.memory_space<vmem>>) attributes {dimension_semantics = [#tpu.dimension_semantics<parallel>], iteration_bounds = array<i64: 1>, scalar_prefetch = 0 : i64, scratch_operands = 0 : i64, tpu.core_type = #tpu.core_type<tc>, window_params = [{transform_indices = @transform_0, window_bounds = array<i64: 16, 128>}, {transform_indices = @transform_1, window_bounds = array<i64: 16, 128>}, {pipeline_mode = #tpu.pipeline_mode<synchronous>, transform_indices = @transform_2, window_bounds = array<i64: 128, 384>}, {pipeline_mode = #tpu.pipeline_mode<synchronous>, transform_indices = @transform_3, window_bounds = array<i64: 128, 256>}, {pipeline_mode = #tpu.pipeline_mode<synchronous>, transform_indices = @transform_4, window_bounds = array<i64: 128, 128>}, {pipeline_mode = #tpu.pipeline_mode<synchronous>, transform_indices = @transform_5, window_bounds = array<i64: 1, 384>}, {transform_indices = @transform_6, window_bounds = array<i64: 16, 128>}]} {
    %c0 = arith.constant 0 : index
    %c0_0 = arith.constant 0 : index
    %0 = vector.load %arg1[%c0, %c0_0] : memref<16x128xf32, #tpu.memory_space<vmem>>, vector<16x128xf32>
    %c0_1 = arith.constant 0 : index
    %c0_2 = arith.constant 0 : index
    %1 = vector.load %arg2[%c0_1, %c0_2] : memref<16x128xf32, #tpu.memory_space<vmem>>, vector<16x128xf32>
    %c0_3 = arith.constant 0 : index
    %c0_4 = arith.constant 0 : index
    %2 = vector.load %arg3[%c0_3, %c0_4] : memref<128x384xf32, #tpu.memory_space<vmem>>, vector<128x384xf32>
    %cst = arith.constant dense<0.000000e+00> : vector<16x384xf32>
    %3 = tpu.matmul %1, %2, %cst {dimension_numbers = #tpu.dot_dimension_numbers<[1], [0], [0], [1], [0, 0, 1, 1], [], []>} : vector<16x128xf32>, vector<128x384xf32>, vector<16x384xf32> -> vector<16x384xf32>
    %c0_5 = arith.constant 0 : index
    %c0_6 = arith.constant 0 : index
    %4 = vector.load %arg6[%c0_5, %c0_6] : memref<1x384xf32, #tpu.memory_space<vmem>>, vector<1x384xf32>
    %5 = vector.broadcast %4 : vector<1x384xf32> to vector<16x384xf32>
    %6 = arith.addf %3, %5 : vector<16x384xf32>
    %c0_7 = arith.constant 0 : index
    %c0_8 = arith.constant 0 : index
    %7 = vector.load %arg4[%c0_7, %c0_8] : memref<128x256xf32, #tpu.memory_space<vmem>>, vector<128x256xf32>
    %cst_9 = arith.constant dense<0.000000e+00> : vector<16x256xf32>
    %8 = tpu.matmul %0, %7, %cst_9 {dimension_numbers = #tpu.dot_dimension_numbers<[1], [0], [0], [1], [0, 0, 1, 1], [], []>} : vector<16x128xf32>, vector<128x256xf32>, vector<16x256xf32> -> vector<16x256xf32>
    %9 = vector.extract_strided_slice %6 {offsets = [0, 0], sizes = [16, 128], strides = [1, 1]} : vector<16x384xf32> to vector<16x128xf32>
    %10 = vector.extract_strided_slice %8 {offsets = [0, 0], sizes = [16, 128], strides = [1, 1]} : vector<16x256xf32> to vector<16x128xf32>
    %11 = arith.addf %9, %10 : vector<16x128xf32>
    %12 = arith.negf %11 : vector<16x128xf32>
    %13 = math.exp %12 : vector<16x128xf32>
    %cst_10 = arith.constant 1.000000e+00 : f32
    %14 = vector.broadcast %cst_10 : f32 to vector<16x128xf32>
    %15 = arith.addf %14, %13 : vector<16x128xf32>
    %16 = arith.divf %14, %15 : vector<16x128xf32>
    %17 = vector.extract_strided_slice %6 {offsets = [0, 128], sizes = [16, 128], strides = [1, 1]} : vector<16x384xf32> to vector<16x128xf32>
    %18 = vector.extract_strided_slice %8 {offsets = [0, 128], sizes = [16, 128], strides = [1, 1]} : vector<16x256xf32> to vector<16x128xf32>
    %19 = arith.addf %17, %18 : vector<16x128xf32>
    %20 = arith.negf %19 : vector<16x128xf32>
    %21 = math.exp %20 : vector<16x128xf32>
    %cst_11 = arith.constant 1.000000e+00 : f32
    %22 = vector.broadcast %cst_11 : f32 to vector<16x128xf32>
    %23 = arith.addf %22, %21 : vector<16x128xf32>
    %24 = arith.divf %22, %23 : vector<16x128xf32>
    %25 = arith.mulf %16, %0 : vector<16x128xf32>
    %26 = vector.extract_strided_slice %6 {offsets = [0, 256], sizes = [16, 128], strides = [1, 1]} : vector<16x384xf32> to vector<16x128xf32>
    %c0_12 = arith.constant 0 : index
    %c0_13 = arith.constant 0 : index
    %27 = vector.load %arg5[%c0_12, %c0_13] : memref<128x128xf32, #tpu.memory_space<vmem>>, vector<128x128xf32>
    %cst_14 = arith.constant dense<0.000000e+00> : vector<16x128xf32>
    %28 = tpu.matmul %25, %27, %cst_14 {dimension_numbers = #tpu.dot_dimension_numbers<[1], [0], [0], [1], [0, 0, 1, 1], [], []>} : vector<16x128xf32>, vector<128x128xf32>, vector<16x128xf32> -> vector<16x128xf32>
    %29 = arith.addf %26, %28 : vector<16x128xf32>
    %30 = math.tanh %29 : vector<16x128xf32>
    %cst_15 = arith.constant 1.000000e+00 : f32
    %31 = vector.broadcast %cst_15 : f32 to vector<16x128xf32>
    %32 = arith.subf %31, %24 : vector<16x128xf32>
    %33 = arith.mulf %32, %0 : vector<16x128xf32>
    %34 = arith.mulf %24, %30 : vector<16x128xf32>
    %35 = arith.addf %33, %34 : vector<16x128xf32>
    %c0_16 = arith.constant 0 : index
    %c0_17 = arith.constant 0 : index
    %36 = vector.load %arg7[%c0_16, %c0_17] : memref<16x128xf32, #tpu.memory_space<vmem>>, vector<16x128xf32>
    tpu.vector_store %arg7[%c0_16, %c0_17], %35 {strides = array<i32>} : memref<16x128xf32, #tpu.memory_space<vmem>>, vector<16x128xf32>,
    return
  }
  func.func @transform_0(%arg0: i32) -> (i32, i32) {
    %c0_i32 = arith.constant 0 : i32
    %c0_i32_0 = arith.constant 0 : i32
    return %arg0, %c0_i32 : i32, i32
  }
  func.func @transform_1(%arg0: i32) -> (i32, i32) {
    %c0_i32 = arith.constant 0 : i32
    %c0_i32_0 = arith.constant 0 : i32
    return %arg0, %c0_i32 : i32, i32
  }
  func.func @transform_2(%arg0: i32) -> (i32, i32) {
    %c0_i32 = arith.constant 0 : i32
    %c0_i32_0 = arith.constant 0 : i32
    %c0_i32_1 = arith.constant 0 : i32
    return %c0_i32, %c0_i32_0 : i32, i32
  }
  func.func @transform_3(%arg0: i32) -> (i32, i32) {
    %c0_i32 = arith.constant 0 : i32
    %c0_i32_0 = arith.constant 0 : i32
    %c0_i32_1 = arith.constant 0 : i32
    return %c0_i32, %c0_i32_0 : i32, i32
  }
  func.func @transform_4(%arg0: i32) -> (i32, i32) {
    %c0_i32 = arith.constant 0 : i32
    %c0_i32_0 = arith.constant 0 : i32
    %c0_i32_1 = arith.constant 0 : i32
    return %c0_i32, %c0_i32_0 : i32, i32
  }
  func.func @transform_5(%arg0: i32) -> (i32, i32) {
    %c0_i32 = arith.constant 0 : i32
    %c0_i32_0 = arith.constant 0 : i32
    %c0_i32_1 = arith.constant 0 : i32
    return %c0_i32, %c0_i32_0 : i32, i32
  }
  func.func @transform_6(%arg0: i32) -> (i32, i32) {
    %c0_i32 = arith.constant 0 : i32
    %c0_i32_0 = arith.constant 0 : i32
    return %arg0, %c0_i32 : i32, i32
  }
}

</mosaic_0001>

<bundles_post_ra>
// kernel: gating_mechanism.1
= control target key start
LH: loop header
LB: loop body
LE: loop exit
PB: predicated region body
PF: predicated region fallthrough
CT: control target
= control target key end

     0   :  { %11 = vsyncpa [#allocation3], 0  ;;  %s832_s0 = inlined_call_operand.vmem [shape: f32[16,128], index: 0, kind: input, shape index: {}]   ;;  %s833_s1 = inlined_call_operand.vmem [shape: f32[16,128], index: 1, kind: input, shape index: {}]   ;;  %s834_s2 = inlined_call_operand.hbm [shape: f32[128,384], index: 2, kind: input, shape index: {}]   ;;  %s835_s3 = inlined_call_operand.hbm [shape: f32[128,256], index: 3, kind: input, shape index: {}]   ;;  %s836_s4 = inlined_call_operand.hbm [shape: f32[128,128], index: 4, kind: input, shape index: {}]   ;;  %s837_s5 = inlined_call_operand.vmem [shape: f32[1,384], index: 5, kind: input, shape index: {}]   ;;  %s838_s6 = inlined_call_operand.vmem [shape: f32[16,128], index: 6, kind: output, shape index: {}]  }
   0x1   :  { %12 = vsyncpa [#allocation5], 0  ;;  %s739_s21 = smov [#allocation4]  }
   0x2   :  { %s34_s22 = sshll.u32 %s739_s21, 4  ;;  %s35_s22 = int_to_ptr.vmem [resolvable:$true] %s34_s22 }
   0x3   :  { %s683_s23 = scalar_lea.vmem %s35_s22, 4096  ;;  %p688_p1 = scmp.lt.s32.totalorder %s35_s22, %s35_s22 }
   0x4   :  { %p684_p0 = scmp.ne.s32.totalorder %s35_s22, %s683_s23  ;;  %p689_p2 = scmp.lt.s32.totalorder %s683_s23, %s683_s23 }
   0x6   :  { %p690_p3 = por %p689_p2, %p688_p1 }
   0x8   :  { %p691_p4 = pnand %p690_p3, %p684_p0 }
   0xa   :  { %694 = shalt.err (!%p691_p4)
}
   0xb   :  { %s740_s24 = smov 256   ;;  %s741_s25 = smov 16  }
   0xc   :  { %40 = dma.hbm_to_vmem [thread:$0]  %s835_s3, 4096, %s35_s22, [#allocation5], %s740_s24, %s740_s24, %s741_s25  }
   0xd   :  { %s742_s28 = smov [#allocation2]  }
   0xe   :  { %s22_s29 = sshll.u32 %s742_s28, 4  ;;  %s23_s29 = int_to_ptr.vmem [resolvable:$true] %s22_s29 }
   0xf   :  { %s703_s30 = scalar_lea.vmem %s23_s29, 6144  ;;  %p708_p6 = scmp.lt.s32.totalorder %s23_s29, %s23_s29 }
  0x10   :  { %p704_p5 = scmp.ne.s32.totalorder %s23_s29, %s703_s30  ;;  %p709_p7 = scmp.lt.s32.totalorder %s703_s30, %s703_s30 }
  0x12   :  { %p710_p8 = por %p709_p7, %p708_p6 }
  0x14   :  { %p711_p9 = pnand %p710_p8, %p704_p5 }
  0x16   :  { %714 = shalt.err (!%p711_p9)
}
  0x17   :  { %s743_s7 = smov 384   ;;  %s744_s8 = smov 24  }
  0x18   :  { %28 = dma.hbm_to_vmem [thread:$0]  %s834_s2, 6144, %s23_s29, [#allocation3], %s743_s7, %s743_s7, %s744_s8  }
  0x19   :  { %s745_s11 = smov [#allocation6]  }
  0x1a   :  { %s46_s12 = sshll.u32 %s745_s11, 4  ;;  %s47_s12 = int_to_ptr.vmem [resolvable:$true] %s46_s12 }
  0x1b   :  { %s723_s3 = scalar_lea.vmem %s47_s12, 2048  ;;  %p728_p11 = scmp.lt.s32.totalorder %s47_s12, %s47_s12 }
  0x1c   :  { %p724_p10 = scmp.ne.s32.totalorder %s47_s12, %s723_s3  ;;  %p729_p12 = scmp.lt.s32.totalorder %s723_s3, %s723_s3 }
  0x1e   :  { %p730_p13 = por %p729_p12, %p728_p11 }
  0x20   :  { %p731_p0 = pnand %p730_p13, %p724_p10 }
  0x22   :  { %734 = shalt.err (!%p731_p0)
}
  0x23   :  { %s746_s13 = smov 128   ;;  %s747_s14 = smov 8  }
  0x24   :  { %52 = dma.hbm_to_vmem [thread:$0]  %s836_s4, 2048, %s47_s12, [#allocation5], %s746_s13, %s746_s13, %s747_s14  }
  0x25   :  { %735 = dma.done.wait [#allocation3], 6144  }
  0x26   :  { %736 = vsyncadd [#allocation3], 4294961152 }
  0x27   :  { %737 = dma.done.wait [#allocation5], 6144  }
  0x28   :  { %738 = vsyncadd [#allocation5], 4294961152  ;;  %v748_v0 = vmov 0.0   ;;  %v114_v1 = vld [vmem:[#allocation2 + $0x170] sm:$0xff]  ;;  %v113_v2 = vld [vmem:[#allocation2 + $0x168] sm:$0xff] }
  0x29   :  { %197 = vmatprep.mubr.f32.mxu0 %v748_v0  ;;  %v111_v3 = vld [vmem:[#allocation2 + $0x158] sm:$0xff]  ;;  %133 = vmatprep.subr.mxu0 %v114_v1  ;;  %v110_v4 = vld [vmem:[#allocation2 + $0x150] sm:$0xff]  ;;  %v108_v5 = vld [vmem:[#allocation2 + $0x140] sm:$0xff] }
  0x2a   :  { %134 = vmatpush1.msra.mxu0 %v113_v2  ;;  %v107_v6 = vld [vmem:[#allocation2 + $0x138] sm:$0xff]  ;;  %v105_v7 = vld [vmem:[#allocation2 + $0x128] sm:$0xff]  ;;  %v104_v8 = vld [vmem:[#allocation2 + $0x120] sm:$0xff] }
  0x2b   :  { %135 = vmatprep.subr.mxu0 %v111_v3  ;;  %v102_v9 = vld [vmem:[#allocation2 + $0x110] sm:$0xff]  ;;  %v101_v10 = vld [vmem:[#allocation2 + $0x108] sm:$0xff]  ;;  %v99_v11 = vld [vmem:[#allocation2 + $0xf8] sm:$0xff] }
  0x2c   :  { %136 = vmatpush1.msra.mxu0 %v110_v4  ;;  %v98_v12 = vld [vmem:[#allocation2 + $0xf0] sm:$0xff]  ;;  %v96_v13 = vld [vmem:[#allocation2 + $0xe0] sm:$0xff]  ;;  %v95_v15 = vld [vmem:[#allocation2 + $0xd8] sm:$0xff] }
  0x2d   :  { %137 = vmatprep.subr.mxu0 %v108_v5  ;;  %v66_v14 = vld [vmem:[%s833_s1] sm:$0xff]  ;;  %v93_v16 = vld [vmem:[#allocation2 + $0xc8] sm:$0xff]  ;;  %v90_v18 = vld [vmem:[#allocation2 + $0xb0] sm:$0xff] }
  0x2e   :  { %138 = vmatpush1.msra.mxu0 %v107_v6  ;;  %607 = vmatprep.mubr.f32.mxu1 %v66_v14  ;;  %v92_v17 = vld [vmem:[#allocation2 + $0xc0] sm:$0xff]  ;;  %v89_v19 = vld [vmem:[#allocation2 + $0xa8] sm:$0xff]  ;;  %v87_v20 = vld [vmem:[#allocation2 + $0x98] sm:$0xff] }
  0x2f   :  { %139 = vmatprep.subr.mxu0 %v105_v7  ;;  %v86_v21 = vld [vmem:[#allocation2 + $0x90] sm:$0xff]  ;;  %v84_v22 = vld [vmem:[#allocation2 + $0x80] sm:$0xff]  ;;  %v83_v23 = vld [vmem:[#allocation2 + $0x78] sm:$0xff] }
  0x30   :  { %140 = vmatpush1.msra.mxu0 %v104_v8  ;;  %v81_v24 = vld [vmem:[#allocation2 + $0x68] sm:$0xff]  ;;  %v80_v25 = vld [vmem:[#allocation2 + $0x60] sm:$0xff]  ;;  %v78_v26 = vld [vmem:[#allocation2 + $0x50] sm:$0xff] }
  0x31   :  { %141 = vmatprep.subr.mxu0 %v102_v9  ;;  %v77_v27 = vld [vmem:[#allocation2 + $0x48] sm:$0xff]  ;;  %v75_v28 = vld [vmem:[#allocation2 + $0x38] sm:$0xff]  ;;  %v74_v29 = vld [vmem:[#allocation2 + $0x30] sm:$0xff] }
  0x32   :  { %142 = vmatpush1.msra.mxu0 %v101_v10  ;;  %v72_v30 = vld [vmem:[#allocation2 + $0x20] sm:$0xff]  ;;  %v71_v31 = vld [vmem:[#allocation2 + $0x18] sm:$0xff]  ;;  %v69_v32 = vld [vmem:[#allocation2 + $0x8] sm:$0xff] }
  0x33   :  { %143 = vmatprep.subr.mxu0 %v99_v11  ;;  %v68_v33 = vld [vmem:[#allocation2] sm:$0xff]  ;;  %v316_v34 = vld [vmem:[#allocation4 + $0xf8] sm:$0xff]  ;;  %v315_v35 = vld [vmem:[#allocation4 + $0xf0] sm:$0xff] }
  0x34   :  { %144 = vmatpush1.msra.mxu0 %v98_v12  ;;  %v314_v36 = vld [vmem:[#allocation4 + $0xe8] sm:$0xff]  ;;  %v313_v37 = vld [vmem:[#allocation4 + $0xe0] sm:$0xff]  ;;  %v312_v38 = vld [vmem:[#allocation4 + $0xd8] sm:$0xff] }
  0x35   :  { %145 = vmatprep.subr.mxu0 %v96_v13  ;;  %v801_v39 = vld [vmem:[%s833_s1 + $0x8] sm:$0xff]  ;;  %v311_v40 = vld [vmem:[#allocation4 + $0xd0] sm:$0xff]  ;;  %v309_v42 = vld [vmem:[#allocation4 + $0xc0] sm:$0xff] }
  0x36   :  { %146 = vmatpush1.msra.mxu0 %v95_v15  ;;  %v310_v41 = vld [vmem:[#allocation4 + $0xc8] sm:$0xff]  ;;  %v308_v43 = vld [vmem:[#allocation4 + $0xb8] sm:$0xff]  ;;  %v307_v44 = vld [vmem:[#allocation4 + $0xb0] sm:$0xff] }
  0x37   :  { %147 = vmatprep.subr.mxu0 %v93_v16  ;;  %v306_v45 = vld [vmem:[#allocation4 + $0xa8] sm:$0xff]  ;;  %v305_v46 = vld [vmem:[#allocation4 + $0xa0] sm:$0xff]  ;;  %v304_v47 = vld [vmem:[#allocation4 + $0x98] sm:$0xff] }
  0x38   :  { %148 = vmatpush1.msra.mxu0 %v92_v17  ;;  %v303_v48 = vld [vmem:[#allocation4 + $0x90] sm:$0xff]  ;;  %v302_v49 = vld [vmem:[#allocation4 + $0x88] sm:$0xff]  ;;  %v301_v50 = vld [vmem:[#allocation4 + $0x80] sm:$0xff] }
  0x39   :  { %149 = vmatprep.subr.mxu0 %v90_v18  ;;  %v300_v51 = vld [vmem:[#allocation4 + $0x78] sm:$0xff]  ;;  %v299_v52 = vld [vmem:[#allocation4 + $0x70] sm:$0xff]  ;;  %v298_v53 = vld [vmem:[#allocation4 + $0x68] sm:$0xff] }
  0x3a   :  { %150 = vmatpush1.msra.mxu0 %v89_v19  ;;  %v297_v54 = vld [vmem:[#allocation4 + $0x60] sm:$0xff]  ;;  %v296_v55 = vld [vmem:[#allocation4 + $0x58] sm:$0xff]  ;;  %v295_v56 = vld [vmem:[#allocation4 + $0x50] sm:$0xff] }
  0x3b   :  { %151 = vmatprep.subr.mxu0 %v87_v20  ;;  %v294_v57 = vld [vmem:[#allocation4 + $0x48] sm:$0xff]  ;;  %v293_v58 = vld [vmem:[#allocation4 + $0x40] sm:$0xff]  ;;  %v292_v59 = vld [vmem:[#allocation4 + $0x38] sm:$0xff] }
  0x3c   :  { %152 = vmatpush1.msra.mxu0 %v86_v21  ;;  %v291_v60 = vld [vmem:[#allocation4 + $0x30] sm:$0xff]  ;;  %v290_v61 = vld [vmem:[#allocation4 + $0x28] sm:$0xff]  ;;  %v289_v62 = vld [vmem:[#allocation4 + $0x20] sm:$0xff] }
  0x3d   :  { %153 = vmatprep.subr.mxu0 %v84_v22  ;;  %v288_v63 = vld [vmem:[#allocation4 + $0x18] sm:$0xff]  ;;  %v287_v1 = vld [vmem:[#allocation4 + $0x10] sm:$0xff]  ;;  %v286_v2 = vld [vmem:[#allocation4 + $0x8] sm:$0xff] }
  0x3e   :  { %154 = vmatpush1.msra.mxu0 %v83_v23  ;;  %v285_v3 = vld [vmem:[#allocation4] sm:$0xff]  ;;  %v815_v5 = vld [vmem:[%s832_s0 + $0x8] sm:$0xff]  ;;  %v115_v6 = vld [vmem:[#allocation2 + $0x178] sm:$0xff] }
  0x3f   :  { %155 = vmatprep.subr.mxu0 %v81_v24  ;;  %v808_v4 = vld [vmem:[%s832_s0] sm:$0xff]  ;;  %575 = vmatprep.subr.mxu1 %v115_v6  ;;  %v109_v8 = vld [vmem:[#allocation2 + $0x148] sm:$0xff]  ;;  %v106_v9 = vld [vmem:[#allocation2 + $0x130] sm:$0xff] }
  0x40   :  { %156 = vmatpush1.msra.mxu0 %v80_v25  ;;  %v112_v7 = vld [vmem:[#allocation2 + $0x160] sm:$0xff]  ;;  %576 = vmatpush3.msra.mxu1 %v115_v6  ;;  %v103_v10 = vld [vmem:[#allocation2 + $0x118] sm:$0xff]  ;;  %v97_v11 = vld [vmem:[#allocation2 + $0xe8] sm:$0xff] }
  0x41   :  { %157 = vmatprep.subr.mxu0 %v78_v26  ;;  %577 = vmatprep.subr.mxu1 %v112_v7  ;;  %v94_v12 = vld [vmem:[#allocation2 + $0xd0] sm:$0xff]  ;;  %v91_v13 = vld [vmem:[#allocation2 + $0xb8] sm:$0xff]  ;;  %v85_v15 = vld [vmem:[#allocation2 + $0x88] sm:$0xff] }
  0x42   :  { %158 = vmatpush1.msra.mxu0 %v77_v27  ;;  %578 = vmatpush3.msra.mxu1 %v112_v7  ;;  %v82_v16 = vld [vmem:[#allocation2 + $0x70] sm:$0xff]  ;;  %v79_v17 = vld [vmem:[#allocation2 + $0x58] sm:$0xff]  ;;  %v76_v18 = vld [vmem:[#allocation2 + $0x40] sm:$0xff] }
  0x43   :  { %159 = vmatprep.subr.mxu0 %v75_v28  ;;  %579 = vmatprep.subr.mxu1 %v109_v8  ;;  %v73_v19 = vld [vmem:[#allocation2 + $0x28] sm:$0xff]  ;;  %v70_v20 = vld [vmem:[#allocation2 + $0x10] sm:$0xff]  ;;  %v439_v21 = vld [vmem:[#allocation6 + $0x78] sm:$0xff] }
  0x44   :  { %160 = vmatpush1.msra.mxu0 %v74_v29  ;;  %580 = vmatpush3.msra.mxu1 %v109_v8  ;;  %v438_v22 = vld [vmem:[#allocation6 + $0x70] sm:$0xff]  ;;  %v437_v23 = vld [vmem:[#allocation6 + $0x68] sm:$0xff]  ;;  %v436_v24 = vld [vmem:[#allocation6 + $0x60] sm:$0xff] }
  0x45   :  { %161 = vmatprep.subr.mxu0 %v72_v30  ;;  %581 = vmatprep.subr.mxu1 %v106_v9  ;;  %v435_v25 = vld [vmem:[#allocation6 + $0x58] sm:$0xff]  ;;  %v434_v26 = vld [vmem:[#allocation6 + $0x50] sm:$0xff]  ;;  %v433_v27 = vld [vmem:[#allocation6 + $0x48] sm:$0xff] }
  0x46   :  { %162 = vmatpush1.msra.mxu0 %v71_v31  ;;  %582 = vmatpush3.msra.mxu1 %v106_v9  ;;  %v432_v28 = vld [vmem:[#allocation6 + $0x40] sm:$0xff]  ;;  %v431_v29 = vld [vmem:[#allocation6 + $0x38] sm:$0xff]  ;;  %v430_v30 = vld [vmem:[#allocation6 + $0x30] sm:$0xff] }
  0x47   :  { %163 = vmatprep.subr.mxu0 %v69_v32  ;;  %583 = vmatprep.subr.mxu1 %v103_v10  ;;  %v429_v31 = vld [vmem:[#allocation6 + $0x28] sm:$0xff]  ;;  %v428_v32 = vld [vmem:[#allocation6 + $0x20] sm:$0xff] }
  0x48   :  { %164 = vmatpush1.msra.mxu0 %v68_v33  ;;  %584 = vmatpush3.msra.mxu1 %v103_v10  ;;  %v427_v33 = vld [vmem:[#allocation6 + $0x18] sm:$0xff] }
  0x49   :  { %198 = vmatmul.mubr.f32.vlgmr.msra.gmra.mxu0 %v66_v14  ;;  %317 = vmatprep.subr.mxu0 %v316_v34  ;;  %v88_v14 = vld [vmem:[#allocation2 + $0xa0] sm:$0xff]  ;;  %v426_v34 = vld [vmem:[#allocation6 + $0x10] sm:$0xff] }
  0x4a   :  { %318 = vmatpush1.msra.mxu0 %v315_v35  ;;  %203 = vmatprep.mubr.f32.mxu0 %v748_v0  ;;  %v425_v35 = vld [vmem:[#allocation6 + $0x8] sm:$0xff] }
  0x4b   :  { %319 = vmatprep.subr.mxu0 %v314_v36  ;;  %v424_v36 = vld [vmem:[#allocation6] sm:$0xff] }
  0x4c   :  { %320 = vmatpush1.msra.mxu0 %v313_v37  ;;  %v118_v37 = vlaneseq }
  0x4d   :  { %321 = vmatprep.subr.mxu0 %v312_v38  ;;  %204 = vmatmul.mubr.f32.gmra.mxu0 %v801_v39 }
  0x4e   :  { %322 = vmatpush1.msra.mxu0 %v311_v40  ;;  %381 = vmatprep.mubr.f32.mxu0 %v748_v0  ;;  %v119_v38 = vshrl.u32 %v118_v37, 7 }
  0x4f   :  { %323 = vmatprep.subr.mxu0 %v310_v41  ;;  %v116_v41 = vld [vmem:[%s837_s5] sm:$0x7] }
  0x50   :  { %324 = vmatpush1.msra.mxu0 %v309_v42  ;;  %v120_v40 = vsub.s32 0, %v119_v38 }
  0x51   :  { %325 = vmatprep.subr.mxu0 %v308_v43  ;;  %v124_v43 = vsub.s32 1, %v119_v38 }
  0x52   :  { %326 = vmatpush1.msra.mxu0 %v307_v44 }
  0x53   :  { %327 = vmatprep.subr.mxu0 %v306_v45  ;;  %v121_v45 = vrot.slane %v116_v41, %v120_v40 }
  0x54   :  { %328 = vmatpush1.msra.mxu0 %v305_v46  ;;  %v125_v46 = vrot.slane %v116_v41, %v124_v43 }
  0x55   :  { %329 = vmatprep.subr.mxu0 %v304_v47 }
  0x56   :  { %330 = vmatpush1.msra.mxu0 %v303_v48 }
  0x57   :  { %331 = vmatprep.subr.mxu0 %v302_v49 }
  0x58   :  { %332 = vmatpush1.msra.mxu0 %v301_v50 }
  0x59   :  { %333 = vmatprep.subr.mxu0 %v300_v51 }
  0x5a   :  { %334 = vmatpush1.msra.mxu0 %v299_v52 }
  0x5b   :  { %335 = vmatprep.subr.mxu0 %v298_v53 }
  0x5c   :  { %336 = vmatpush1.msra.mxu0 %v297_v54 }
  0x5d   :  { %337 = vmatprep.subr.mxu0 %v296_v55 }
  0x5e   :  { %338 = vmatpush1.msra.mxu0 %v295_v56 }
  0x5f   :  { %339 = vmatprep.subr.mxu0 %v294_v57 }
  0x60   :  { %340 = vmatpush1.msra.mxu0 %v293_v58 }
  0x61   :  { %341 = vmatprep.subr.mxu0 %v292_v59 }
  0x62   :  { %342 = vmatpush1.msra.mxu0 %v291_v60 }
  0x63   :  { %343 = vmatprep.subr.mxu0 %v290_v61 }
  0x64   :  { %344 = vmatpush1.msra.mxu0 %v289_v62 }
  0x65   :  { %345 = vmatprep.subr.mxu0 %v288_v63 }
  0x66   :  { %346 = vmatpush1.msra.mxu0 %v287_v1 }
  0x67   :  { %347 = vmatprep.subr.mxu0 %v286_v2 }
  0x68   :  { %348 = vmatpush1.msra.mxu0 %v285_v3 }
  0x69   :  { %382 = vmatmul.mubr.f32.vlgmr.msra.gmra.mxu0 %v808_v4 }
  0x6a   :  { %387 = vmatprep.mubr.f32.mxu0 %v748_v0  ;;  %v100_v0 = vld [vmem:[#allocation2 + $0x100] sm:$0xff] }
  0x6b   :  { %585 = vmatprep.subr.mxu1 %v100_v0 }
  0x6c   :  { %586 = vmatpush3.msra.mxu1 %v100_v0 }
  0x6d   :  { %388 = vmatmul.mubr.f32.gmra.mxu0 %v815_v5  ;;  %587 = vmatprep.subr.mxu1 %v97_v11 }
  0x6e   :  { %588 = vmatpush3.msra.mxu1 %v97_v11  ;;  %v128_v11 = vsub.s32 2, %v119_v38 }
  0x6f   :  { %589 = vmatprep.subr.mxu1 %v94_v12 }
  0x70   :  { %590 = vmatpush3.msra.mxu1 %v94_v12 }
  0x71   :  { %591 = vmatprep.subr.mxu1 %v91_v13 }
  0x72   :  { %592 = vmatpush3.msra.mxu1 %v91_v13 }
  0x73   :  { %593 = vmatprep.subr.mxu1 %v88_v14 }
  0x74   :  { %594 = vmatpush3.msra.mxu1 %v88_v14 }
  0x75   :  { %595 = vmatprep.subr.mxu1 %v85_v15 }
  0x76   :  { %596 = vmatpush3.msra.mxu1 %v85_v15 }
  0x77   :  { %597 = vmatprep.subr.mxu1 %v82_v16 }
  0x78   :  { %598 = vmatpush3.msra.mxu1 %v82_v16  ;;  %v129_v16 = vrot.slane %v116_v41, %v128_v11 }
  0x79   :  { %599 = vmatprep.subr.mxu1 %v79_v17 }
  0x7a   :  { %600 = vmatpush3.msra.mxu1 %v79_v17 }
  0x7b   :  { %601 = vmatprep.subr.mxu1 %v76_v18 }
  0x7c   :  { %602 = vmatpush3.msra.mxu1 %v76_v18 }
  0x7d   :  { %603 = vmatprep.subr.mxu1 %v73_v19 }
  0x7e   :  { %604 = vmatpush3.msra.mxu1 %v73_v19 }
  0x7f   :  { %605 = vmatprep.subr.mxu1 %v70_v20 }
  0x80   :  { %606 = vmatpush3.msra.mxu1 %v70_v20 }
  0x81   :  { %608 = vmatmul.mubr.f32.vlgmr.msra.gmra.mxu1 %v801_v39  ;;  %610 = vmatprep.subr.mxu1 %v439_v21 }
  0x82   :  { %611 = vmatpush3.msra.mxu1 %v439_v21 }
  0x83   :  { %612 = vmatprep.subr.mxu1 %v438_v22 }
  0x84   :  { %613 = vmatpush3.msra.mxu1 %v438_v22 }
  0x85   :  { %614 = vmatprep.subr.mxu1 %v437_v23 }
  0x86   :  { %615 = vmatpush3.msra.mxu1 %v437_v23 }
  0x87   :  { %616 = vmatprep.subr.mxu1 %v436_v24 }
  0x88   :  { %617 = vmatpush3.msra.mxu1 %v436_v24 }
  0x89   :  { %618 = vmatprep.subr.mxu1 %v435_v25 }
  0x8a   :  { %619 = vmatpush3.msra.mxu1 %v435_v25 }
  0x8b   :  { %620 = vmatprep.subr.mxu1 %v434_v26 }
  0x8c   :  { %621 = vmatpush3.msra.mxu1 %v434_v26 }
  0x8d   :  { %622 = vmatprep.subr.mxu1 %v433_v27 }
  0x8e   :  { %623 = vmatpush3.msra.mxu1 %v433_v27 }
  0x8f   :  { %624 = vmatprep.subr.mxu1 %v432_v28 }
  0x90   :  { %625 = vmatpush3.msra.mxu1 %v432_v28 }
  0x91   :  { %626 = vmatprep.subr.mxu1 %v431_v29 }
  0x92   :  { %627 = vmatpush3.msra.mxu1 %v431_v29 }
  0x93   :  { %628 = vmatprep.subr.mxu1 %v430_v30 }
  0x94   :  { %629 = vmatpush3.msra.mxu1 %v430_v30 }
  0x95   :  { %630 = vmatprep.subr.mxu1 %v429_v31 }
  0x96   :  { %631 = vmatpush3.msra.mxu1 %v429_v31 }
  0x97   :  { %632 = vmatprep.subr.mxu1 %v428_v32 }
  0x98   :  { %633 = vmatpush3.msra.mxu1 %v428_v32 }
  0x99   :  { %634 = vmatprep.subr.mxu1 %v427_v33 }
  0x9a   :  { %635 = vmatpush3.msra.mxu1 %v427_v33 }
  0x9b   :  { %636 = vmatprep.subr.mxu1 %v426_v34 }
  0x9c   :  { %637 = vmatpush3.msra.mxu1 %v426_v34 }
  0x9d   :  { %638 = vmatprep.subr.mxu1 %v425_v35 }
  0x9e   :  { %639 = vmatpush3.msra.mxu1 %v425_v35 }
  0x9f   :  { %640 = vmatprep.subr.mxu1 %v424_v36 }
  0xa0   :  { %641 = vmatpush3.msra.mxu1 %v424_v36 }
 0x109   :  { %v199_v39 = vpop.f32.mrf.mxu0 }
 0x10a   :  { %v200_v48 = vadd.f32 %v199_v39, %v121_v45 }
 0x10b   :  { %v201_v42 = vpop.f32.mrf.mxu0 }
 0x10c   :  { %v202_v50 = vadd.f32 %v201_v42, %v125_v46 }
 0x10d   :  { %v205_v44 = vpop.f32.mrf.mxu0 }
 0x10e   :  { %v206_v53 = vadd.f32 %v205_v44, %v121_v45 }
 0x10f   :  { %v207_v47 = vpop.f32.mrf.mxu0 }
 0x110   :  { %v208_v7 = vadd.f32 %v207_v47, %v125_v46 }
 0x129   :  { %v383_v49 = vpop.f32.mrf.mxu0 }
 0x12a   :  { %v394_v51 = vadd.f32 %v383_v49, %v200_v48 }
 0x12b   :  { %v385_v52 = vpop.f32.mrf.mxu0 }
 0x12c   :  { %v535_v54 = vmul.f32 -1.442695, %v394_v51  ;;  %v408_v55 = vadd.f32 %v385_v52, %v202_v50 }
 0x12d   :  { %v389_v56 = vpop.f32.mrf.mxu0 }
 0x12e   :  { %655 = vpow2.f32 %v535_v54  ;;  %v395_v57 = vadd.f32 %v389_v56, %v206_v53  ;;  %v537_v10 = vmul.f32 -1.442695, %v408_v55 }
 0x12f   :  { %v391_v6 = vpop.f32.mrf.mxu0 }
 0x130   :  { %v536_v58 = vmul.f32 -1.442695, %v395_v57  ;;  %v409_v8 = vadd.f32 %v391_v6, %v208_v7 }
 0x132   :  { %657 = vpow2.f32 %v536_v58  ;;  %v538_v9 = vmul.f32 -1.442695, %v409_v8 }
 0x13b   :  { %v656_v59 = vpop.eup %655 }
 0x13c   :  { %v402_v60 = vadd.f32 1.0, %v656_v59 }
 0x13e   :  { %659 = vrcp.f32 %v402_v60 }
 0x13f   :  { %v658_v61 = vpop.eup %657 }
 0x140   :  { %v403_v62 = vadd.f32 1.0, %v658_v61 }
 0x141   :  { %v609_v14 = vpop.f32.mrf.mxu1 }
 0x142   :  { %661 = vrcp.f32 %v403_v62  ;;  %v282_v18 = vadd.f32 %v609_v14, %v129_v16 }
 0x143   :  { %663 = vpow2.f32 %v538_v9  ;;  %v276_v17 = vpop.f32.mrf.mxu1 }
 0x144   :  { %665 = vpow2.f32 %v537_v10  ;;  %v277_v20 = vadd.f32 %v276_v17, %v129_v16 }
 0x14b   :  { %v660_v63 = vpop.eup %659 }
 0x14c   :  { %v422_v1 = vmul.f32 %v660_v63, %v808_v4 }
 0x14e   :  { %642 = vmatprep.mubr.f32.mxu1 %v422_v1 }
 0x14f   :  { %v662_v2 = vpop.eup %661 }
 0x150   :  { %v423_v3 = vmul.f32 %v662_v2, %v815_v5  ;;  %v664_v0 = vpop.eup %663 }
 0x151   :  { %v666_v12 = vpop.eup %665  ;;  %v417_v13 = vadd.f32 1.0, %v664_v0 }
 0x152   :  { %643 = vmatmul.mubr.f32.vlgmr.msra.gmra.mxu1 %v423_v3  ;;  %v416_v15 = vadd.f32 1.0, %v666_v12 }
 0x153   :  { %667 = vrcp.f32 %v417_v13 }
 0x154   :  { %669 = vrcp.f32 %v416_v15 }
 0x160   :  { %v668_v24 = vpop.eup %667 }
 0x161   :  { %v670_v25 = vpop.eup %669  ;;  %v520_v26 = vsub.f32 1.0, %v668_v24 }
 0x162   :  { %v519_v27 = vsub.f32 1.0, %v670_v25 }
 0x163   :  { %v522_v29 = vmul.f32 %v520_v26, %v815_v5 }
 0x164   :  { %v521_v33 = vmul.f32 %v519_v27, %v808_v4 }
 0x212   :  { %v644_v19 = vpop.f32.mrf.mxu1 }
 0x213   :  { %v516_v21 = vadd.f32 %v644_v19, %v282_v18 }
 0x214   :  { %v506_v22 = vpop.f32.mrf.mxu1 }
 0x215   :  { %671 = vtanh.f32 %v516_v21  ;;  %v515_v23 = vadd.f32 %v506_v22, %v277_v20 }
 0x217   :  { %673 = vtanh.f32 %v515_v23 }
 0x222   :  { %v672_v28 = vpop.eup %671 }
 0x223   :  { %v524_v30 = vmul.f32 %v672_v28, %v668_v24 }
 0x224   :  { %v674_v31 = vpop.eup %673 }
 0x225   :  { %v526_v32 = vadd.f32 %v524_v30, %v522_v29  ;;  %v523_v34 = vmul.f32 %v674_v31, %v670_v25 }
 0x227   :  { %528 = vst [vmem:[%s838_s6 + $0x8] sm:$0xff] %v526_v32  ;;  %v525_v35 = vadd.f32 %v523_v34, %v521_v33 }
 0x229   :  { %527 = vst [vmem:[%s838_s6] sm:$0xff] %v525_v35 }
 0x22a   :  { %533 = vsyncpa [#allocation3], 1 }
 0x22b   :  { %534 = vsyncpa [#allocation5], 1 }

</bundles_post_ra>
